<compile_context>
chip_gen: v7x
topology: tpu7x:2x2x1
jax: 0.10.0
libtpu: 0.0.40
codegen_flags: <defaults>
</compile_context>

<pallas_src>
from functools import partial

import jax
import jax.numpy as jnp
from jax import lax
from jax.experimental import pallas as pl
from jax.experimental.pallas import tpu as pltpu


def _round_up(x, m):
    return ((x + m - 1) // m) * m


def _cdiv(a, b):
    return -(-a // b)


def critic_kernel(x_ref, w1_ref, b1_ref, w2_ref, b2_ref, w3_ref, b3_ref,
                  out_ref, *, relu_lanes):
    # Fused layer 1 + concat: block-diagonal W1f maps the packed
    # [state | action | 0] row to [h1_pre | action | 0] in one MXU matmul
    # (bf16 operands, f32 accumulate).
    y = jnp.dot(x_ref[...], w1_ref[...], preferred_element_type=jnp.float32)
    y = y + b1_ref[...]

    # ReLU only on the h1 lanes; the action passthrough lanes keep their sign;
    # the remaining lanes are exactly zero (zero weight rows + zero bias).
    lane = lax.broadcasted_iota(jnp.int32, y.shape, 1)
    x2 = jnp.where(lane < relu_lanes, jnp.maximum(y, 0.0), y)
    x2 = x2.astype(jnp.bfloat16)                                 # [TM, 128]

    # Layer 2: fused K=128, N=256 MXU matmul, then bias + ReLU in f32.
    h2 = jnp.dot(x2, w2_ref[...], preferred_element_type=jnp.float32)
    h2 = jnp.maximum(h2 + b2_ref[...], 0.0)                      # [TM, 256]

    # Output head (N=1): VPU multiply + lane reduction instead of an MXU
    # matmul with a single output column.  W3 is already f32.
    out_ref[...] = (jnp.sum(h2 * w3_ref[...], axis=-1, keepdims=True)
                    + b3_ref[...])


def critic_forward(state, action, packed, *, tm=1024):
    """Full critic forward pass as one batch-gridded Pallas kernel.

    `packed` comes from pack_params() (padded / fused weights in kernel layout).
    """
    B, s = state.shape
    a = action.shape[1]

    in_pad, k2 = packed["w1"].shape        # 64, 128
    d1 = packed["w2"].shape[1]             # 256
    d0 = packed["meta"]["d0"]              # 64 (ReLU lane boundary)

    # Balanced tile selection: pad waste < 1 tile, and >= 2 grid steps when the
    # batch allows it so the "parallel" batch axis can shard across v7x's two
    # TensorCores (near-zero cost on single-TC v5e / v6e).
    n_steps = max(_cdiv(B, tm), 1)
    if B >= 16:
        n_steps = max(n_steps, 2)
    TM = _round_up(_cdiv(B, n_steps), 8)
    Bp = TM * n_steps

    # Single packed [state | action | 0] bf16 input row (64 lanes).
    x = jnp.zeros((Bp, in_pad), jnp.bfloat16)
    x = x.at[:B, :s].set(state.astype(jnp.bfloat16))
    x = x.at[:B, s:s + a].set(action.astype(jnp.bfloat16))

    out = pl.pallas_call(
        partial(critic_kernel, relu_lanes=d0),
        out_shape=jax.ShapeDtypeStruct((Bp, 1), jnp.float32),
        grid=(n_steps,),
        in_specs=[
            pl.BlockSpec((TM, in_pad), lambda i: (i, 0)),   # packed rows (move)
            pl.BlockSpec((in_pad, k2), lambda i: (0, 0)),   # fused W1 (resident)
            pl.BlockSpec((1, k2),      lambda i: (0, 0)),   # fused b1
            pl.BlockSpec((k2, d1),     lambda i: (0, 0)),   # fused W2
            pl.BlockSpec((1, d1),      lambda i: (0, 0)),   # b2
            pl.BlockSpec((1, d1),      lambda i: (0, 0)),   # W3 as an f32 row
            pl.BlockSpec((1, 1),       lambda i: (0, 0)),   # b3
        ],
        out_specs=pl.BlockSpec((TM, 1), lambda i: (i, 0)),
        compiler_params=pltpu.CompilerParams(
            dimension_semantics=("parallel",)),
    )(x, packed["w1"], packed["b1"], packed["w2"], packed["b2"],
      packed["w3"], packed["b3"])

    return out[:B]


def init_params(key, state_size, action_size, inter_dims=(64, 256)):
    """Deterministic synthetic init mirroring the PyTorch layer shapes/bounds."""
    d0, d1 = inter_dims
    ks = jax.random.split(key, 6)

    def unif(k, shape, bound):
        return jax.random.uniform(k, shape, jnp.float32, -bound, bound)

    b_in = float(state_size) ** -0.5
    b_cat = float(d0 + action_size) ** -0.5
    b_out = float(d1) ** -0.5
    return {
        "w1": unif(ks[0], (state_size, d0), b_in),
        "b1": unif(ks[1], (d0,), b_in),
        "w2": unif(ks[2], (d0 + action_size, d1), b_cat),
        "b2": unif(ks[3], (d1,), b_cat),
        "w3": unif(ks[4], (d1, 1), 0.003),        # output layer: uniform(-3e-3, 3e-3)
        "b3": unif(ks[5], (1,), b_out),
    }


def pack_params(params, *, in_pad=64, k2=128):
    """Pad / fuse / cast logical params into the kernel layout.

    w1 -> block-diagonal (in_pad, k2) bf16: W1 for the state columns, an
          identity block that passes the action through to lanes [d0, d0+a).
    w2 -> (k2, d1) bf16 with zero rows for the padding lanes.
    w3 -> (1, d1) f32 row (no per-step cast in the kernel).
    """
    s, d0 = params["w1"].shape              # 33, 64
    k_cat, d1 = params["w2"].shape           # 68, 256
    a = k_cat - d0                            # 4

    w1f = jnp.zeros((in_pad, k2), jnp.float32)
    w1f = w1f.at[:s, :d0].set(params["w1"])
    w1f = w1f.at[s:s + a, d0:d0 + a].set(jnp.eye(a, dtype=jnp.float32))

    b1f = jnp.zeros((1, k2), jnp.float32).at[0, :d0].set(params["b1"])

    w2f = jnp.zeros((k2, d1), jnp.float32)
    w2f = w2f.at[:d0].set(params["w2"][:d0])           # rows for h1
    w2f = w2f.at[d0:d0 + a].set(params["w2"][d0:])     # rows for action (rest zero)

    return {
        "w1": w1f.astype(jnp.bfloat16),
        "b1": b1f,
        "w2": w2f.astype(jnp.bfloat16),
        "b2": params["b2"].reshape(1, d1).astype(jnp.float32),
        "w3": params["w3"].reshape(1, d1).astype(jnp.float32),
        "b3": params["b3"].reshape(1, 1).astype(jnp.float32),
        "meta": {"state_size": s, "action_size": a, "d0": d0},
    }


def critic_forward_ref(state, action, params):
    """Pure-JAX f32 reference for correctness checking."""
    h1 = jnp.maximum(state @ params["w1"] + params["b1"], 0.0)
    x = jnp.concatenate([h1, action], axis=1)
    h2 = jnp.maximum(x @ params["w2"] + params["b2"], 0.0)
    return h2 @ params["w3"] + params["b3"]


if __name__ == "__main__":
    # Shapes consistent with the module: state vector of length 33,
    # action vector of length 4, batch of 8.
    B, STATE, ACTION = 8, 33, 4
    key = jax.random.PRNGKey(0)
    k_s, k_a, k_p = jax.random.split(key, 3)

    state = jax.random.normal(k_s, (B, STATE), jnp.float32)
    action = jax.random.normal(k_a, (B, ACTION), jnp.float32)
    params = init_params(k_p, STATE, ACTION)
    packed = pack_params(params)

    out = critic_forward(state, action, packed)
    out = jax.block_until_ready(out)

    ref = critic_forward_ref(state, action, params)
    assert out.shape == (B, 1)
    assert jnp.allclose(out, ref, atol=2e-2, rtol=2e-2), "mismatch vs reference"

    print("KERNEL_OK")
</pallas_src>

<mosaic_0001>
module attributes {stable_mosaic.version = 11 : i64} {
  func.func @critic_kernel(%arg0: i32, %arg1: memref<8x64xbf16, #tpu.memory_space<vmem>>, %arg2: memref<64x128xbf16, #tpu.memory_space<vmem>>, %arg3: memref<1x128xf32, #tpu.memory_space<vmem>>, %arg4: memref<128x256xbf16, #tpu.memory_space<vmem>>, %arg5: memref<1x256xf32, #tpu.memory_space<vmem>>, %arg6: memref<1x256xf32, #tpu.memory_space<vmem>>, %arg7: memref<1x1xf32, #tpu.memory_space<vmem>>, %arg8: memref<8x1xf32, #tpu.memory_space<vmem>>) attributes {dimension_semantics = [#tpu.dimension_semantics<parallel>], iteration_bounds = array<i64: 1>, scalar_prefetch = 0 : i64, scratch_operands = 0 : i64, tpu.core_type = #tpu.core_type<tc>, window_params = [{transform_indices = @transform_0, window_bounds = array<i64: 8, 64>}, {pipeline_mode = #tpu.pipeline_mode<synchronous>, transform_indices = @transform_1, window_bounds = array<i64: 64, 128>}, {pipeline_mode = #tpu.pipeline_mode<synchronous>, transform_indices = @transform_2, window_bounds = array<i64: 1, 128>}, {pipeline_mode = #tpu.pipeline_mode<synchronous>, transform_indices = @transform_3, window_bounds = array<i64: 128, 256>}, {pipeline_mode = #tpu.pipeline_mode<synchronous>, transform_indices = @transform_4, window_bounds = array<i64: 1, 256>}, {pipeline_mode = #tpu.pipeline_mode<synchronous>, transform_indices = @transform_5, window_bounds = array<i64: 1, 256>}, {pipeline_mode = #tpu.pipeline_mode<synchronous>, transform_indices = @transform_6, window_bounds = array<i64: 1, 1>}, {transform_indices = @transform_7, window_bounds = array<i64: 8, 1>}]} {
    %c0 = arith.constant 0 : index
    %c0_0 = arith.constant 0 : index
    %0 = vector.load %arg1[%c0, %c0_0] : memref<8x64xbf16, #tpu.memory_space<vmem>>, vector<8x64xbf16>
    %c0_1 = arith.constant 0 : index
    %c0_2 = arith.constant 0 : index
    %1 = vector.load %arg2[%c0_1, %c0_2] : memref<64x128xbf16, #tpu.memory_space<vmem>>, vector<64x128xbf16>
    %cst = arith.constant dense<0.000000e+00> : vector<8x128xf32>
    %2 = tpu.matmul %0, %1, %cst {dimension_numbers = #tpu.dot_dimension_numbers<[1], [0], [0], [1], [0, 0, 1, 1], [], []>} : vector<8x64xbf16>, vector<64x128xbf16>, vector<8x128xf32> -> vector<8x128xf32>
    %c0_3 = arith.constant 0 : index
    %c0_4 = arith.constant 0 : index
    %3 = vector.load %arg3[%c0_3, %c0_4] : memref<1x128xf32, #tpu.memory_space<vmem>>, vector<1x128xf32>
    %4 = vector.broadcast %3 : vector<1x128xf32> to vector<8x128xf32>
    %5 = arith.addf %2, %4 : vector<8x128xf32>
    %6 = tpu.iota {dimensions = array<i32: 1>} : vector<8x128xi32>
    %c64_i32 = arith.constant 64 : i32
    %7 = vector.broadcast %c64_i32 : i32 to vector<8x128xi32>
    %8 = arith.cmpi slt, %6, %7 : vector<8x128xi32>
    %cst_5 = arith.constant 0.000000e+00 : f32
    %9 = vector.broadcast %cst_5 : f32 to vector<8x128xf32>
    %10 = arith.maximumf %5, %9 : vector<8x128xf32>
    %11 = arith.select %8, %10, %5 : vector<8x128xi1>, vector<8x128xf32>
    %12 = arith.truncf %11 : vector<8x128xf32> to vector<8x128xbf16>
    %c0_6 = arith.constant 0 : index
    %c0_7 = arith.constant 0 : index
    %13 = vector.load %arg4[%c0_6, %c0_7] : memref<128x256xbf16, #tpu.memory_space<vmem>>, vector<128x256xbf16>
    %cst_8 = arith.constant dense<0.000000e+00> : vector<8x256xf32>
    %14 = tpu.matmul %12, %13, %cst_8 {dimension_numbers = #tpu.dot_dimension_numbers<[1], [0], [0], [1], [0, 0, 1, 1], [], []>} : vector<8x128xbf16>, vector<128x256xbf16>, vector<8x256xf32> -> vector<8x256xf32>
    %c0_9 = arith.constant 0 : index
    %c0_10 = arith.constant 0 : index
    %15 = vector.load %arg5[%c0_9, %c0_10] : memref<1x256xf32, #tpu.memory_space<vmem>>, vector<1x256xf32>
    %16 = vector.broadcast %15 : vector<1x256xf32> to vector<8x256xf32>
    %17 = arith.addf %14, %16 : vector<8x256xf32>
    %cst_11 = arith.constant 0.000000e+00 : f32
    %18 = vector.broadcast %cst_11 : f32 to vector<8x256xf32>
    %19 = arith.maximumf %17, %18 : vector<8x256xf32>
    %c0_12 = arith.constant 0 : index
    %c0_13 = arith.constant 0 : index
    %20 = vector.load %arg6[%c0_12, %c0_13] : memref<1x256xf32, #tpu.memory_space<vmem>>, vector<1x256xf32>
    %21 = vector.broadcast %20 : vector<1x256xf32> to vector<8x256xf32>
    %22 = arith.mulf %19, %21 : vector<8x256xf32>
    %cst_14 = arith.constant dense<0.000000e+00> : vector<8xf32>
    %23 = vector.multi_reduction <add>, %22, %cst_14 [1] : vector<8x256xf32> to vector<8xf32>
    %24 = vector.shape_cast %23 : vector<8xf32> to vector<8x1xf32>
    %c0_15 = arith.constant 0 : index
    %c0_16 = arith.constant 0 : index
    %25 = vector.load %arg7[%c0_15, %c0_16] : memref<1x1xf32, #tpu.memory_space<vmem>>, vector<1x1xf32>
    %26 = vector.broadcast %25 : vector<1x1xf32> to vector<8x1xf32>
    %27 = arith.addf %24, %26 : vector<8x1xf32>
    %c0_17 = arith.constant 0 : index
    %c0_18 = arith.constant 0 : index
    %28 = vector.load %arg8[%c0_17, %c0_18] : memref<8x1xf32, #tpu.memory_space<vmem>>, vector<8x1xf32>
    tpu.vector_store %arg8[%c0_17, %c0_18], %27 {strides = array<i32>} : memref<8x1xf32, #tpu.memory_space<vmem>>, vector<8x1xf32>,
    return
  }
  func.func @transform_0(%arg0: i32) -> (i32, i32) {
    %c0_i32 = arith.constant 0 : i32
    %c0_i32_0 = arith.constant 0 : i32
    return %arg0, %c0_i32 : i32, i32
  }
  func.func @transform_1(%arg0: i32) -> (i32, i32) {
    %c0_i32 = arith.constant 0 : i32
    %c0_i32_0 = arith.constant 0 : i32
    %c0_i32_1 = arith.constant 0 : i32
    return %c0_i32, %c0_i32_0 : i32, i32
  }
  func.func @transform_2(%arg0: i32) -> (i32, i32) {
    %c0_i32 = arith.constant 0 : i32
    %c0_i32_0 = arith.constant 0 : i32
    %c0_i32_1 = arith.constant 0 : i32
    return %c0_i32, %c0_i32_0 : i32, i32
  }
  func.func @transform_3(%arg0: i32) -> (i32, i32) {
    %c0_i32 = arith.constant 0 : i32
    %c0_i32_0 = arith.constant 0 : i32
    %c0_i32_1 = arith.constant 0 : i32
    return %c0_i32, %c0_i32_0 : i32, i32
  }
  func.func @transform_4(%arg0: i32) -> (i32, i32) {
    %c0_i32 = arith.constant 0 : i32
    %c0_i32_0 = arith.constant 0 : i32
    %c0_i32_1 = arith.constant 0 : i32
    return %c0_i32, %c0_i32_0 : i32, i32
  }
  func.func @transform_5(%arg0: i32) -> (i32, i32) {
    %c0_i32 = arith.constant 0 : i32
    %c0_i32_0 = arith.constant 0 : i32
    %c0_i32_1 = arith.constant 0 : i32
    return %c0_i32, %c0_i32_0 : i32, i32
  }
  func.func @transform_6(%arg0: i32) -> (i32, i32) {
    %c0_i32 = arith.constant 0 : i32
    %c0_i32_0 = arith.constant 0 : i32
    %c0_i32_1 = arith.constant 0 : i32
    return %c0_i32, %c0_i32_0 : i32, i32
  }
  func.func @transform_7(%arg0: i32) -> (i32, i32) {
    %c0_i32 = arith.constant 0 : i32
    %c0_i32_0 = arith.constant 0 : i32
    return %arg0, %c0_i32 : i32, i32
  }
}

</mosaic_0001>

<bundles_post_ra>
// kernel: tpu_custom_call.1
= control target key start
LH: loop header
LB: loop body
LE: loop exit
PB: predicated region body
PF: predicated region fallthrough
CT: control target
= control target key end

     0   :  { %s591_s0 = inlined_call_operand.hbm [shape: bf16[8,64], index: 0, kind: input, shape index: {}]   ;;  %s592_s1 = inlined_call_operand.hbm [shape: bf16[64,128], index: 1, kind: input, shape index: {}]   ;;  %s593_s2 = inlined_call_operand.vmem [shape: f32[1,128], index: 2, kind: input, shape index: {}]   ;;  %s594_s3 = inlined_call_operand.hbm [shape: bf16[128,256], index: 3, kind: input, shape index: {}]   ;;  %s595_s4 = inlined_call_operand.vmem [shape: f32[1,256], index: 4, kind: input, shape index: {}]   ;;  %s596_s5 = inlined_call_operand.vmem [shape: f32[1,256], index: 5, kind: input, shape index: {}]   ;;  %s597_s6 = inlined_call_operand.<no memory space> [shape: f32[1,1], index: 6, kind: input, shape index: {}]   ;;  %s598_s7 = inlined_call_operand.vmem [shape: f32[8,1], index: 7, kind: output, shape index: {}]  }
   0x1   :  { %v12_v0 = vstv %s597_s6 }
   0x2   :  { %13 = vst [vmem:[#allocation2] sm:$0x1] %v12_v0 }
   0x3   :  { %14 = vsyncpa [#allocation4], 0 }
   0x4   :  { %15 = vsyncpa [#allocation6], 0  ;;  %s490_s26 = smov [#allocation5]   ;;  %s420_s30 = scalar_lea.hbm %s592_s1, 512 }
   0x5   :  { %s31_s27 = sshll.u32 %s490_s26, 4  ;;  %p421_p0 = scmp.ne.s32.totalorder %s592_s1, %s420_s30  ;;  %s32_s27 = int_to_ptr.vmem [resolvable:$true] %s31_s27 }
   0x6   :  { %p424_p1 = scmp.lt.u32.totalorder %s420_s30, %s592_s1 }
   0x8   :  { %p426_p2 = pnand %p424_p1, %p421_p0 }
   0xa   :  { %429 = shalt.err (!%p426_p2)
}
   0xb   :  { %s430_s6 = scalar_lea.vmem %s32_s27, 512  ;;  %p435_p4 = scmp.lt.s32.totalorder %s32_s27, %s32_s27 }
   0xc   :  { %p431_p3 = scmp.ne.s32.totalorder %s32_s27, %s430_s6  ;;  %p436_p5 = scmp.lt.s32.totalorder %s430_s6, %s430_s6 }
   0xe   :  { %p437_p6 = por %p436_p5, %p435_p4 }
  0x10   :  { %p438_p7 = pnand %p437_p6, %p431_p3 }
  0x12   :  { %441 = shalt.err (!%p438_p7)
}
  0x13   :  { %s491_s12 = smov 64   ;;  %s492_s13 = smov 4  }
  0x14   :  { %37 = dma.hbm_to_vmem [thread:$0]  %s592_s1, 512, %s32_s27, [#allocation6], %s491_s12, %s491_s12, %s492_s13  }
  0x15   :  { %s493_s16 = smov [#allocation3]   ;;  %s494_s18 = smov [#allocation7]  }
  0x16   :  { %s22_s17 = sshll.u32 %s493_s16, 4  ;;  %s45_s19 = sshll.u32 %s494_s18, 4  ;;  %s23_s17 = int_to_ptr.vmem [resolvable:$true] %s22_s17  ;;  %s46_s19 = int_to_ptr.vmem [resolvable:$true] %s45_s19 }
  0x17   :  { %s442_s22 = scalar_lea.hbm %s591_s0, 64 }
  0x18   :  { %p443_p8 = scmp.ne.s32.totalorder %s591_s0, %s442_s22  ;;  %p446_p9 = scmp.lt.u32.totalorder %s442_s22, %s591_s0 }
  0x1a   :  { %p448_p10 = pnand %p446_p9, %p443_p8 }
  0x1c   :  { %451 = shalt.err (!%p448_p10)
}
  0x1d   :  { %s452_s1 = scalar_lea.vmem %s23_s17, 64  ;;  %p457_p12 = scmp.lt.s32.totalorder %s23_s17, %s23_s17 }
  0x1e   :  { %p453_p11 = scmp.ne.s32.totalorder %s23_s17, %s452_s1  ;;  %p458_p13 = scmp.lt.s32.totalorder %s452_s1, %s452_s1 }
  0x20   :  { %p459_p0 = por %p458_p13, %p457_p12 }
  0x22   :  { %p460_p1 = pnand %p459_p0, %p453_p11 }
  0x24   :  { %463 = shalt.err (!%p460_p1)
}
  0x25   :  { %25 = dma.hbm_to_vmem [thread:$0]  %s591_s0, 64, %s23_s17, [#allocation4]  }
  0x26   :  { %s464_s8 = scalar_lea.hbm %s594_s3, 2048 }
  0x27   :  { %p465_p2 = scmp.ne.s32.totalorder %s594_s3, %s464_s8  ;;  %p468_p3 = scmp.lt.u32.totalorder %s464_s8, %s594_s3 }
  0x29   :  { %p470_p4 = pnand %p468_p3, %p465_p2 }
  0x2b   :  { %473 = shalt.err (!%p470_p4)
}
  0x2c   :  { %s474_s12 = scalar_lea.vmem %s46_s19, 2048  ;;  %p479_p6 = scmp.lt.s32.totalorder %s46_s19, %s46_s19 }
  0x2d   :  { %p475_p5 = scmp.ne.s32.totalorder %s46_s19, %s474_s12  ;;  %p480_p7 = scmp.lt.s32.totalorder %s474_s12, %s474_s12 }
  0x2f   :  { %p481_p8 = por %p480_p7, %p479_p6 }
  0x31   :  { %p482_p9 = pnand %p481_p8, %p475_p5 }
  0x33   :  { %485 = shalt.err (!%p482_p9)
}
  0x34   :  { %s495_s0 = smov 128   ;;  %s496_s13 = smov 8  }
  0x35   :  { %51 = dma.hbm_to_vmem [thread:$0]  %s594_s3, 2048, %s46_s19, [#allocation6], %s495_s0, %s495_s0, %s496_s13  }
  0x36   :  { %486 = dma.done.wait [#allocation4], 64  }
  0x37   :  { %487 = vsyncadd [#allocation4], 4294967232 }
  0x38   :  { %488 = dma.done.wait [#allocation6], 2560  }
  0x39   :  { %489 = vsyncadd [#allocation6], 4294964736  ;;  %v497_v1 = vmov 0.0   ;;  %vm498_vm0 = vmmov 0   ;;  %v392_v2 = vld [vmem:[#allocation5] sm:$0xff]   ;;  %v393_v3 = vld [vmem:[#allocation5 + $0x8] sm:$0xff]   ;;  %v152_v24 = vlaneseq }
  0x3a   :  { %370 = vmatprep.subr.bf16.mxu0 %v497_v1  ;;  %378 = vmatprep.mubr.msk.bf16.mxu0 %vm498_vm0, %v497_v1  ;;  %v396_v4 = vld [vmem:[#allocation7 + $0x4] ss:$8 sps:$4 sm:$0xff]   ;;  %v398_v5 = vld [vmem:[#allocation7] ss:$8 sps:$4 sm:$0xff]   ;;  %v394_v6 = vld [vmem:[#allocation5 + $0x10] sm:$0xff]   ;;  %vm108_vm1 = vcmask 523264  }
  0x3b   :  { %371 = vmatpush3.bf16.msra.mxu0 %v392_v2  ;;  %v399_v7 = vld [vmem:[#allocation7 + $0x14] ss:$8 sps:$4 sm:$0xff]   ;;  %266 = vmatprep.subr.bf16.mxu1 %v396_v4  ;;  %v401_v8 = vld [vmem:[#allocation7 + $0x10] ss:$8 sps:$4 sm:$0xff]   ;;  %v402_v9 = vld [vmem:[#allocation7 + $0x24] ss:$8 sps:$4 sm:$0xff]  }
  0x3c   :  { %372 = vmatprep.subr.bf16.mxu0 %v497_v1  ;;  %267 = vmatpush1.bf16.msra.mxu1 %v398_v5  ;;  %v395_v10 = vld [vmem:[#allocation5 + $0x18] sm:$0xff]   ;;  %v404_v11 = vld [vmem:[#allocation7 + $0x20] ss:$8 sps:$4 sm:$0xff]   ;;  %v408_v15 = vld [vmem:[#allocation7 + $0x44] ss:$8 sps:$4 sm:$0xff]   ;;  %v499_v23 = vmov 0  }
  0x3d   :  { %268 = vmatprep.subr.bf16.mxu1 %v399_v7  ;;  %v405_v12 = vld [vmem:[#allocation7 + $0x34] ss:$8 sps:$4 sm:$0xff]   ;;  %v407_v14 = vld [vmem:[#allocation7 + $0x30] ss:$8 sps:$4 sm:$0xff]   ;;  %v410_v16 = vld [vmem:[#allocation7 + $0x40] ss:$8 sps:$4 sm:$0xff]   ;;  %298 = vmatprep.mubr.bf16.mxu1 %v499_v23 }
  0x3e   :  { %v68_v13 = vld [vmem:[#allocation3] sm:$0xf]  ;;  %v413_v18 = vld [vmem:[#allocation7 + $0x50] ss:$8 sps:$4 sm:$0xff]   ;;  %v414_v19 = vld [vmem:[#allocation7 + $0x64] ss:$8 sps:$4 sm:$0xff]  }
  0x3f   :  { %373 = vmatpush3.bf16.msra.mxu0 %v393_v3  ;;  %v411_v17 = vld [vmem:[#allocation7 + $0x54] ss:$8 sps:$4 sm:$0xff]   ;;  %v416_v20 = vld [vmem:[#allocation7 + $0x60] ss:$8 sps:$4 sm:$0xff]   ;;  %v419_v22 = vld [vmem:[#allocation7 + $0x70] ss:$8 sps:$4 sm:$0xff]  }
  0x40   :  { %374 = vmatprep.subr.bf16.mxu0 %v497_v1  ;;  %269 = vmatpush1.bf16.msra.mxu1 %v401_v8  ;;  %v417_v21 = vld [vmem:[#allocation7 + $0x74] ss:$8 sps:$4 sm:$0xff]   ;;  %v342_v25 = vld [vmem:[%s593_s2] ss:$0 sm:$0xff]  ;;  %v153_v26 = vand.u32 127, %v152_v24  ;;  %v177_v35 = vshrl.u32 %v152_v24, 7 }
  0x41   :  { %270 = vmatprep.subr.bf16.mxu1 %v402_v9  ;;  %v174_v37 = vld [vmem:[%s595_s4] sm:$0x3]  ;;  %vm334_vm3 = vcmask 7168  }
  0x42   :  { %vm154_vm2 = vcmp.lt.s32.totalorder %v153_v26, 64  ;;  %v178_v36 = vsub.s32 0, %v177_v35  ;;  %v182_v38 = vsub.s32 1, %v177_v35  ;;  %v309_v41 = vld [vmem:[%s596_s5] sm:$0x3] }
  0x43   :  { %375 = vmatpush3.bf16.msra.mxu0 %v394_v6  ;;  %v364_v55 = vld [vmem:[#allocation2] ss:$0 sm:$0xff] }
  0x44   :  { %376 = vmatprep.subr.bf16.mxu0 %v497_v1  ;;  %271 = vmatpush1.bf16.msra.mxu1 %v404_v11  ;;  %v179_v39 = vrot.slane %v174_v37, %v178_v36  ;;  %v183_v40 = vrot.slane %v174_v37, %v182_v38  ;;  %v314_v45 = vrot.slane %v309_v41, %v178_v36 }
  0x45   :  { %272 = vmatprep.subr.bf16.mxu1 %v405_v12  ;;  %v318_v48 = vrot.slane %v309_v41, %v182_v38 }
  0x47   :  { %377 = vmatpush3.bf16.msra.mxu0 %v395_v10 }
  0x48   :  { %273 = vmatpush1.bf16.msra.mxu1 %v407_v14 }
  0x49   :  { %274 = vmatprep.subr.bf16.mxu1 %v408_v15 }
  0x4a   :  { %379 = vmatmul.mubr.msk.bf16.vlgmr.msra.gmra.mrb[0].mxu0 %vm108_vm1, %v68_v13 }
  0x4c   :  { %275 = vmatpush1.bf16.msra.mxu1 %v410_v16 }
  0x4d   :  { %276 = vmatprep.subr.bf16.mxu1 %v411_v17 }
  0x50   :  { %277 = vmatpush1.bf16.msra.mxu1 %v413_v18 }
  0x51   :  { %278 = vmatprep.subr.bf16.mxu1 %v414_v19 }
  0x54   :  { %279 = vmatpush1.bf16.msra.mxu1 %v416_v20 }
  0x55   :  { %280 = vmatprep.subr.bf16.mxu1 %v417_v21 }
  0x58   :  { %281 = vmatpush1.bf16.msra.mxu1 %v419_v22 }
 0x11d   :  { %v146_v27 = vpop.f32.mrb[0].mxu0 }
 0x11e   :  { %v147_v28 = vadd.f32 %v342_v25, %v146_v27  ;;  %v380_v29 = vpop.f32.mrb[1].mxu0 }
 0x11f   :  { %v149_v30 = vpop.f32.mrb[2].mxu0 }
 0x120   :  { %v155_v31 = vmax.f32 %v147_v28, 0.0  ;;  %v381_v32 = vpop.f32.mrb[3].mxu0 }
 0x122   :  { %v156_v33 = vsel %vm154_vm2, %v155_v31, %v147_v28 }
 0x123   :  { %v157_v34 = vpack.c.bf16 %v156_v33, %v156_v33 }
 0x125   :  { %299 = vmatmul.mubr.bf16.vlgmr.msra.gmra.mrb[0].mxu1 %v157_v34 }
 0x1f8   :  { %v300_v42 = vpop.f32.mrb[0].mxu1 }
 0x1f9   :  { %v301_v43 = vadd.f32 %v300_v42, %v179_v39  ;;  %v302_v44 = vpop.f32.mrb[1].mxu1 }
 0x1fa   :  { %v303_v46 = vadd.f32 %v302_v44, %v183_v40  ;;  %v304_v47 = vpop.f32.mrb[2].mxu1 }
 0x1fb   :  { %v307_v49 = vmax.f32 %v301_v43, 0.0  ;;  %v305_v50 = vpop.f32.mrb[3].mxu1 }
 0x1fc   :  { %v308_v51 = vmax.f32 %v303_v46, 0.0 }
 0x1fd   :  { %v321_v52 = vmul.f32 %v314_v45, %v307_v49 }
 0x1fe   :  { %v322_v53 = vmul.f32 %v318_v48, %v308_v51 }
 0x200   :  { %v323_v54 = vadd.f32 %v322_v53, %v321_v52 }
 0x202   :  { %324 = vadd.xlane.f32.xlu0 %v323_v54 }
 0x28f   :  { %v325_v56 = vpop.xlane.xlu0 %324 }
 0x290   :  { %v333_v57 = vadd.f32 %v364_v55, %v325_v56 }
 0x292   :  { %335 = vst.msk [vmem:[%s598_s7] sm:$0xff] %vm334_vm3, %v333_v57 }
 0x293   :  { %340 = vsyncpa [#allocation4], 1 }
 0x294   :  { %341 = vsyncpa [#allocation6], 1 }

</bundles_post_ra>
